<compile_context>
chip_gen: v5e
topology: v5e:2x2
jax: 0.10.0
libtpu: 0.0.40
codegen_flags: <defaults>
</compile_context>

<pallas_src>
import jax
import jax.numpy as jnp
from jax.experimental import pallas as pl
from jax.experimental.pallas import tpu as pltpu


_LANES = 128
_VMEM_LIMIT_BYTES = 32 * 1024 * 1024  # safe scoped limit on v5e/v6e/v7x


def qnetwork_kernel(x_ref, w1_ref, b1_ref, w2_ref, b2_ref, w3_ref, b3_ref, o_ref):
    # fc1 + ReLU: bf16 operands, f32 accumulation on the MXU.
    x = x_ref[...].astype(jnp.bfloat16)
    h1 = jnp.dot(x, w1_ref[...], preferred_element_type=jnp.float32)
    h1 = jnp.maximum(h1 + b1_ref[...], 0.0).astype(jnp.bfloat16)
    # fc2 + ReLU
    h2 = jnp.dot(h1, w2_ref[...], preferred_element_type=jnp.float32)
    h2 = jnp.maximum(h2 + b2_ref[...], 0.0).astype(jnp.bfloat16)
    # fc3 (no activation); output feature dim is zero-padded to 128 lanes at
    # param-prep time, so this store is an unmasked full-lane vst.
    out = jnp.dot(h2, w3_ref[...], preferred_element_type=jnp.float32) + b3_ref[...]
    o_ref[...] = out.astype(o_ref.dtype)


def _round_up(x, m):
    return (x + m - 1) // m * m


def _chip_info():
    """Crude chip-generation heuristic from device_kind (safe default = v6e-like)."""
    kind = ""
    try:
        kind = jax.devices()[0].device_kind.lower()
    except Exception:
        pass
    if "v7" in kind:
        return {"num_tc": 2, "mxu": 256, "cap": 1024}
    if "v5" in kind:
        # v5e: 1 TC, 128x128 MXU, single vst slot -> smaller batch tile cap.
        return {"num_tc": 1, "mxu": 128, "cap": 512}
    # v6e and anything unrecognized.
    return {"num_tc": 1, "mxu": 256, "cap": 1024}


def _choose_tile_b(B, info):
    """Returns (tile_b, padded_B). tile_b divides padded_B.

    - Whole batch as a single block when it fits under the per-chip cap
      (single grid step: no serial-loop overhead on 1-TC chips).
    - Split into 2 grid steps only on 2-TC chips (v7x megacore), keeping each
      tile a multiple of 16 (bf16 sublane pair).
    - Large batches: MXU-M-aligned fixed tile; batch zero-padded up to a
      multiple of it (never a giant whole-batch block -> bounded VMEM).
    """
    cap, mxu, num_tc = info["cap"], info["mxu"], info["num_tc"]
    if B <= cap:
        if num_tc >= 2 and B >= 32 and B % 32 == 0:
            return B // 2, B
        return B, B
    tile = cap - (cap % mxu)  # 512 on v5e, 1024 on v6e/v7x (both MXU-aligned)
    return tile, _round_up(B, tile)


def _vmem_estimate_bytes(tile_b, S, H, A_pad, x_itemsize, out_itemsize):
    """Rough VMEM footprint: double-buffered inputs/outputs + f32 intermediates."""
    weights = 2 * ((S * H + H * H + H * A_pad) * 2 + (2 * H + A_pad) * 4)
    io = 2 * (tile_b * S * x_itemsize + tile_b * A_pad * out_itemsize)
    interm = 2 * tile_b * H * 4 + tile_b * A_pad * 4
    return weights + io + interm


def prepare_qnetwork_params(params_f32):
    """One-time conversion (hoisted out of the per-call hot path):
    weights -> bf16, fc3 weight/bias zero-padded to a lane-dense width."""
    A = int(params_f32["w3"].shape[1])
    A_pad = _round_up(max(A, _LANES), _LANES)
    w3 = params_f32["w3"].astype(jnp.bfloat16)
    b3 = params_f32["b3"].astype(jnp.float32)
    if A_pad != A:
        w3 = jnp.pad(w3, ((0, 0), (0, A_pad - A)))
        b3 = jnp.pad(b3, ((0, 0), (0, A_pad - A)))
    return {
        "w1": params_f32["w1"].astype(jnp.bfloat16),
        "b1": params_f32["b1"].astype(jnp.float32),
        "w2": params_f32["w2"].astype(jnp.bfloat16),
        "b2": params_f32["b2"].astype(jnp.float32),
        "w3": w3,   # (H, A_pad) bf16
        "b3": b3,   # (1, A_pad) f32
        "action_size": A,
    }


def qnetwork_forward(state, prepared, *, tile_b=None, out_dtype=jnp.bfloat16):
    """state: (B, state_size) f32 (cast to bf16 in-kernel).
    prepared: output of prepare_qnetwork_params. Returns (B, action_size) bf16."""
    B, S = state.shape
    H = prepared["w1"].shape[1]
    A = prepared["action_size"]
    A_pad = prepared["w3"].shape[1]

    info = _chip_info()
    if tile_b is None:
        tile_b, B_pad = _choose_tile_b(B, info)
    else:
        B_pad = _round_up(B, tile_b)
    assert B_pad % tile_b == 0

    est = _vmem_estimate_bytes(tile_b, S, H, A_pad,
                               state.dtype.itemsize, jnp.dtype(out_dtype).itemsize)
    assert est <= _VMEM_LIMIT_BYTES, (
        f"estimated VMEM footprint {est} B exceeds limit {_VMEM_LIMIT_BYTES} B; "
        f"reduce tile_b or fc_units")

    if B_pad != B:
        state = jnp.pad(state, ((0, B_pad - B), (0, 0)))

    grid = (B_pad // tile_b,)

    # Batch is tiled; weights/biases use constant index maps (loaded once,
    # resident in VMEM across grid steps).
    in_specs = [
        pl.BlockSpec((tile_b, S), lambda i: (i, 0)),     # state (f32, cast in-kernel)
        pl.BlockSpec((S, H), lambda i: (0, 0)),          # w1 (bf16)
        pl.BlockSpec((1, H), lambda i: (0, 0)),          # b1 (f32)
        pl.BlockSpec((H, H), lambda i: (0, 0)),          # w2 (bf16)
        pl.BlockSpec((1, H), lambda i: (0, 0)),          # b2 (f32)
        pl.BlockSpec((H, A_pad), lambda i: (0, 0)),      # w3 (bf16, lane-padded)
        pl.BlockSpec((1, A_pad), lambda i: (0, 0)),      # b3 (f32, lane-padded)
    ]
    out_specs = pl.BlockSpec((tile_b, A_pad), lambda i: (i, 0))

    out_padded = pl.pallas_call(
        qnetwork_kernel,
        out_shape=jax.ShapeDtypeStruct((B_pad, A_pad), out_dtype),
        grid=grid,
        in_specs=in_specs,
        out_specs=out_specs,
        compiler_params=pltpu.CompilerParams(
            dimension_semantics=("parallel",),
            vmem_limit_bytes=_VMEM_LIMIT_BYTES,
        ),
    )(state, prepared["w1"], prepared["b1"], prepared["w2"], prepared["b2"],
      prepared["w3"], prepared["b3"])

    return out_padded[:B, :A]


def init_qnetwork_params(key, state_size, action_size, fc_units=256):
    """Deterministic init mimicking nn.Linear default: U(-1/sqrt(fan_in), +1/sqrt(fan_in)).
    Weights stored as (in_features, out_features)."""
    keys = jax.random.split(key, 6)

    def linear(kw, kb, fan_in, fan_out):
        bound = 1.0 / jnp.sqrt(jnp.float32(fan_in))
        w = jax.random.uniform(kw, (fan_in, fan_out), jnp.float32, -bound, bound)
        b = jax.random.uniform(kb, (1, fan_out), jnp.float32, -bound, bound)
        return w, b

    w1, b1 = linear(keys[0], keys[1], state_size, fc_units)
    w2, b2 = linear(keys[2], keys[3], fc_units, fc_units)
    w3, b3 = linear(keys[4], keys[5], fc_units, action_size)
    return {"w1": w1, "b1": b1, "w2": w2, "b2": b2, "w3": w3, "b3": b3}


def qnetwork_ref(state, p):
    """Pure-JAX reference using the same bf16-operand / f32-accumulate recipe."""
    x = state.astype(jnp.bfloat16)
    h = jnp.dot(x, p["w1"].astype(jnp.bfloat16), preferred_element_type=jnp.float32)
    h = jnp.maximum(h + p["b1"], 0.0).astype(jnp.bfloat16)
    h = jnp.dot(h, p["w2"].astype(jnp.bfloat16), preferred_element_type=jnp.float32)
    h = jnp.maximum(h + p["b2"], 0.0).astype(jnp.bfloat16)
    return jnp.dot(h, p["w3"].astype(jnp.bfloat16),
                   preferred_element_type=jnp.float32) + p["b3"]


def qnetwork_ref_f32(state, p):
    """Full-f32 reference of the original module semantics (looser tolerance)."""
    h = jnp.maximum(state @ p["w1"] + p["b1"], 0.0)
    h = jnp.maximum(h @ p["w2"] + p["b2"], 0.0)
    return h @ p["w3"] + p["b3"]


if __name__ == "__main__":
    key = jax.random.PRNGKey(0)
    k_params, k_state = jax.random.split(key)

    batch = 8
    state_size = 8
    action_size = 4
    fc_units = 256  # module default

    params = init_qnetwork_params(k_params, state_size, action_size, fc_units)
    prepared = prepare_qnetwork_params(params)  # one-time: casts/padding hoisted off hot path
    state = jax.random.normal(k_state, (batch, state_size), jnp.float32)

    out = qnetwork_forward(state, prepared)
    out = jax.block_until_ready(out)
    assert out.shape == (batch, action_size)
    assert out.dtype == jnp.bfloat16
    out_f32 = out.astype(jnp.float32)

    # Tight check against the mixed-precision reference (same bf16 casts as kernel,
    # including the bf16 output rounding).
    ref_mixed = qnetwork_ref(state, params).astype(jnp.bfloat16).astype(jnp.float32)
    assert jnp.allclose(out_f32, ref_mixed, atol=2e-2, rtol=2e-2), \
        "mismatch vs mixed-precision reference"

    # Sanity check against the pure-f32 module semantics (bf16 rounding tolerance).
    ref_f32 = qnetwork_ref_f32(state, params)
    assert jnp.allclose(out_f32, ref_f32, atol=5e-2, rtol=5e-2), \
        "mismatch vs f32 reference"

    print("KERNEL_OK")
</pallas_src>

<mosaic_0001>
module attributes {stable_mosaic.version = 11 : i64} {
  func.func @qnetwork_kernel(%arg0: i32, %arg1: memref<8x8xf32, #tpu.memory_space<vmem>>, %arg2: memref<8x256xbf16, #tpu.memory_space<vmem>>, %arg3: memref<1x256xf32, #tpu.memory_space<vmem>>, %arg4: memref<256x256xbf16, #tpu.memory_space<vmem>>, %arg5: memref<1x256xf32, #tpu.memory_space<vmem>>, %arg6: memref<256x128xbf16, #tpu.memory_space<vmem>>, %arg7: memref<1x128xf32, #tpu.memory_space<vmem>>, %arg8: memref<8x128xbf16, #tpu.memory_space<vmem>>) attributes {dimension_semantics = [#tpu.dimension_semantics<parallel>], iteration_bounds = array<i64: 1>, scalar_prefetch = 0 : i64, scratch_operands = 0 : i64, tpu.core_type = #tpu.core_type<tc>, window_params = [{transform_indices = @transform_0, window_bounds = array<i64: 8, 8>}, {pipeline_mode = #tpu.pipeline_mode<synchronous>, transform_indices = @transform_1, window_bounds = array<i64: 8, 256>}, {pipeline_mode = #tpu.pipeline_mode<synchronous>, transform_indices = @transform_2, window_bounds = array<i64: 1, 256>}, {pipeline_mode = #tpu.pipeline_mode<synchronous>, transform_indices = @transform_3, window_bounds = array<i64: 256, 256>}, {pipeline_mode = #tpu.pipeline_mode<synchronous>, transform_indices = @transform_4, window_bounds = array<i64: 1, 256>}, {pipeline_mode = #tpu.pipeline_mode<synchronous>, transform_indices = @transform_5, window_bounds = array<i64: 256, 128>}, {pipeline_mode = #tpu.pipeline_mode<synchronous>, transform_indices = @transform_6, window_bounds = array<i64: 1, 128>}, {transform_indices = @transform_7, window_bounds = array<i64: 8, 128>}]} {
    %c0 = arith.constant 0 : index
    %c0_0 = arith.constant 0 : index
    %0 = vector.load %arg1[%c0, %c0_0] : memref<8x8xf32, #tpu.memory_space<vmem>>, vector<8x8xf32>
    %1 = arith.truncf %0 : vector<8x8xf32> to vector<8x8xbf16>
    %c0_1 = arith.constant 0 : index
    %c0_2 = arith.constant 0 : index
    %2 = vector.load %arg2[%c0_1, %c0_2] : memref<8x256xbf16, #tpu.memory_space<vmem>>, vector<8x256xbf16>
    %cst = arith.constant dense<0.000000e+00> : vector<8x256xf32>
    %3 = tpu.matmul %1, %2, %cst {dimension_numbers = #tpu.dot_dimension_numbers<[1], [0], [0], [1], [0, 0, 1, 1], [], []>} : vector<8x8xbf16>, vector<8x256xbf16>, vector<8x256xf32> -> vector<8x256xf32>
    %c0_3 = arith.constant 0 : index
    %c0_4 = arith.constant 0 : index
    %4 = vector.load %arg3[%c0_3, %c0_4] : memref<1x256xf32, #tpu.memory_space<vmem>>, vector<1x256xf32>
    %5 = vector.broadcast %4 : vector<1x256xf32> to vector<8x256xf32>
    %6 = arith.addf %3, %5 : vector<8x256xf32>
    %cst_5 = arith.constant 0.000000e+00 : f32
    %7 = vector.broadcast %cst_5 : f32 to vector<8x256xf32>
    %8 = arith.maximumf %6, %7 : vector<8x256xf32>
    %9 = arith.truncf %8 : vector<8x256xf32> to vector<8x256xbf16>
    %c0_6 = arith.constant 0 : index
    %c0_7 = arith.constant 0 : index
    %10 = vector.load %arg4[%c0_6, %c0_7] : memref<256x256xbf16, #tpu.memory_space<vmem>>, vector<256x256xbf16>
    %cst_8 = arith.constant dense<0.000000e+00> : vector<8x256xf32>
    %11 = tpu.matmul %9, %10, %cst_8 {dimension_numbers = #tpu.dot_dimension_numbers<[1], [0], [0], [1], [0, 0, 1, 1], [], []>} : vector<8x256xbf16>, vector<256x256xbf16>, vector<8x256xf32> -> vector<8x256xf32>
    %c0_9 = arith.constant 0 : index
    %c0_10 = arith.constant 0 : index
    %12 = vector.load %arg5[%c0_9, %c0_10] : memref<1x256xf32, #tpu.memory_space<vmem>>, vector<1x256xf32>
    %13 = vector.broadcast %12 : vector<1x256xf32> to vector<8x256xf32>
    %14 = arith.addf %11, %13 : vector<8x256xf32>
    %cst_11 = arith.constant 0.000000e+00 : f32
    %15 = vector.broadcast %cst_11 : f32 to vector<8x256xf32>
    %16 = arith.maximumf %14, %15 : vector<8x256xf32>
    %17 = arith.truncf %16 : vector<8x256xf32> to vector<8x256xbf16>
    %c0_12 = arith.constant 0 : index
    %c0_13 = arith.constant 0 : index
    %18 = vector.load %arg6[%c0_12, %c0_13] : memref<256x128xbf16, #tpu.memory_space<vmem>>, vector<256x128xbf16>
    %cst_14 = arith.constant dense<0.000000e+00> : vector<8x128xf32>
    %19 = tpu.matmul %17, %18, %cst_14 {dimension_numbers = #tpu.dot_dimension_numbers<[1], [0], [0], [1], [0, 0, 1, 1], [], []>} : vector<8x256xbf16>, vector<256x128xbf16>, vector<8x128xf32> -> vector<8x128xf32>
    %c0_15 = arith.constant 0 : index
    %c0_16 = arith.constant 0 : index
    %20 = vector.load %arg7[%c0_15, %c0_16] : memref<1x128xf32, #tpu.memory_space<vmem>>, vector<1x128xf32>
    %21 = vector.broadcast %20 : vector<1x128xf32> to vector<8x128xf32>
    %22 = arith.addf %19, %21 : vector<8x128xf32>
    %23 = arith.truncf %22 : vector<8x128xf32> to vector<8x128xbf16>
    %c0_17 = arith.constant 0 : index
    %c0_18 = arith.constant 0 : index
    %24 = vector.load %arg8[%c0_17, %c0_18] : memref<8x128xbf16, #tpu.memory_space<vmem>>, vector<8x128xbf16>
    tpu.vector_store %arg8[%c0_17, %c0_18], %23 {strides = array<i32>} : memref<8x128xbf16, #tpu.memory_space<vmem>>, vector<8x128xbf16>,
    return
  }
  func.func @transform_0(%arg0: i32) -> (i32, i32) {
    %c0_i32 = arith.constant 0 : i32
    %c0_i32_0 = arith.constant 0 : i32
    return %arg0, %c0_i32 : i32, i32
  }
  func.func @transform_1(%arg0: i32) -> (i32, i32) {
    %c0_i32 = arith.constant 0 : i32
    %c0_i32_0 = arith.constant 0 : i32
    %c0_i32_1 = arith.constant 0 : i32
    return %c0_i32, %c0_i32_0 : i32, i32
  }
  func.func @transform_2(%arg0: i32) -> (i32, i32) {
    %c0_i32 = arith.constant 0 : i32
    %c0_i32_0 = arith.constant 0 : i32
    %c0_i32_1 = arith.constant 0 : i32
    return %c0_i32, %c0_i32_0 : i32, i32
  }
  func.func @transform_3(%arg0: i32) -> (i32, i32) {
    %c0_i32 = arith.constant 0 : i32
    %c0_i32_0 = arith.constant 0 : i32
    %c0_i32_1 = arith.constant 0 : i32
    return %c0_i32, %c0_i32_0 : i32, i32
  }
  func.func @transform_4(%arg0: i32) -> (i32, i32) {
    %c0_i32 = arith.constant 0 : i32
    %c0_i32_0 = arith.constant 0 : i32
    %c0_i32_1 = arith.constant 0 : i32
    return %c0_i32, %c0_i32_0 : i32, i32
  }
  func.func @transform_5(%arg0: i32) -> (i32, i32) {
    %c0_i32 = arith.constant 0 : i32
    %c0_i32_0 = arith.constant 0 : i32
    %c0_i32_1 = arith.constant 0 : i32
    return %c0_i32, %c0_i32_0 : i32, i32
  }
  func.func @transform_6(%arg0: i32) -> (i32, i32) {
    %c0_i32 = arith.constant 0 : i32
    %c0_i32_0 = arith.constant 0 : i32
    %c0_i32_1 = arith.constant 0 : i32
    return %c0_i32, %c0_i32_0 : i32, i32
  }
  func.func @transform_7(%arg0: i32) -> (i32, i32) {
    %c0_i32 = arith.constant 0 : i32
    %c0_i32_0 = arith.constant 0 : i32
    return %arg0, %c0_i32 : i32, i32
  }
}

</mosaic_0001>

<bundles_post_ra>
// kernel: tpu_custom_call.1
= control target key start
LH: loop header
LB: loop body
LE: loop exit
PB: predicated region body
PF: predicated region fallthrough
CT: control target
= control target key end

     0   :  { %12 = vsyncpa [#allocation3], 0  ;;  %s1071_s0 = inlined_call_operand.hbm [shape: f32[8,8], index: 0, kind: input, shape index: {}]   ;;  %s1072_s1 = inlined_call_operand.hbm [shape: bf16[8,256], index: 1, kind: input, shape index: {}]   ;;  %s1073_s2 = inlined_call_operand.hbm [shape: f32[1,256], index: 2, kind: input, shape index: {}]   ;;  %s1074_s3 = inlined_call_operand.hbm [shape: bf16[256,256], index: 3, kind: input, shape index: {}]   ;;  %s1075_s4 = inlined_call_operand.vmem [shape: f32[1,256], index: 4, kind: input, shape index: {}]   ;;  %s1076_s5 = inlined_call_operand.hbm [shape: bf16[256,128], index: 5, kind: input, shape index: {}]   ;;  %s1077_s6 = inlined_call_operand.vmem [shape: f32[1,128], index: 6, kind: input, shape index: {}]   ;;  %s1078_s7 = inlined_call_operand.hbm [shape: bf16[8,128], index: 7, kind: output, shape index: {}]  }
   0x1   :  { %13 = vsyncpa [#allocation6], 0 }
   0x2   :  { %14 = vsyncpa [#allocation9], 0  ;;  %s32_s26 = sshll.u32 %s1072_s1, 4  ;;  %s33_s26 = int_to_ptr.hbm [resolvable:$true] %s32_s26 }
   0x3   :  { %15 = vsyncpa [#allocation4], 0  ;;  %s993_s27 = smov [#allocation5]   ;;  %s53_s8 = sshll.u32 %s1074_s3, 4  ;;  %s54_s8 = int_to_ptr.hbm [resolvable:$true] %s53_s8 }
   0x4   :  { %s34_s28 = sshll.u32 %s993_s27, 4  ;;  %s994_s9 = smov [#allocation8]   ;;  %s35_s28 = int_to_ptr.vmem [resolvable:$true] %s34_s28 }
   0x5   :  { %37 = dma.hbm_to_vmem [thread:$0]  %s33_s26, 128, %s35_s28, [#allocation6]  }
   0x6   :  { %s55_s10 = sshll.u32 %s994_s9, 4  ;;  %s995_s11 = smov 128   ;;  %s56_s10 = int_to_ptr.vmem [resolvable:$true] %s55_s10 }
   0x7   :  { %s996_s12 = smov 8   ;;  %s21_s1 = sshll.u32 %s1071_s0, 4  ;;  %s22_s1 = int_to_ptr.hbm [resolvable:$true] %s21_s1 }
   0x8   :  { %61 = dma.hbm_to_vmem [thread:$0]  %s54_s8, 4096, %s56_s10, [#allocation9], %s995_s11, %s995_s11, %s996_s12  }
   0x9   :  { %s997_s15 = smov [#allocation2]   ;;  %s43_s3 = sshll.u32 %s1073_s2, 4  ;;  %s44_s3 = int_to_ptr.hbm [resolvable:$true] %s43_s3 }
   0xa   :  { %s23_s16 = sshll.u32 %s997_s15, 4  ;;  %s998_s19 = smov [#allocation7]   ;;  %s24_s16 = int_to_ptr.vmem [resolvable:$true] %s23_s16 }
   0xb   :  { %26 = dma.hbm_to_vmem [thread:$0]  %s22_s1, 128, %s24_s16, [#allocation3]  }
   0xc   :  { %s45_s20 = sshll.u32 %s998_s19, 4  ;;  %s68_s23 = sshll.u32 %s1076_s5, 4  ;;  %s46_s20 = int_to_ptr.vmem [resolvable:$true] %s45_s20  ;;  %s69_s23 = int_to_ptr.hbm [resolvable:$true] %s68_s23 }
   0xd   :  { %48 = dma.hbm_to_vmem [thread:$0]  %s44_s3, 32, %s46_s20, [#allocation6]  }
   0xe   :  { %s999_s0 = smov [#allocation10]   ;;  %s1000_s25 = smov 64  }
   0xf   :  { %s70_s24 = sshll.u32 %s999_s0, 4  ;;  %s1001_s26 = smov 4   ;;  %s71_s24 = int_to_ptr.vmem [resolvable:$true] %s70_s24 }
  0x10   :  { %76 = dma.hbm_to_vmem [thread:$0]  %s69_s23, 2048, %s71_s24, [#allocation9], %s1000_s25, %s1000_s25, %s1001_s26  }
  0x11   :  { %985 = dma.done.wait [#allocation3], 128  }
  0x12   :  { %986 = vsyncadd [#allocation3], 4294967168 }
  0x13   :  { %987 = dma.done.wait [#allocation6], 160  }
  0x14   :  { %988 = vsyncadd [#allocation6], 4294967136 }
  0x15   :  { %989 = dma.done.wait [#allocation9], 6144  }
  0x16   :  { %990 = vsyncadd [#allocation9], 4294961152  ;;  %v102_v0 = vld [vmem:[#allocation5] sm:$0xff]  ;;  %vm118_vm0 = vcmask 1043456   ;;  %v100_v1 = vld [vmem:[#allocation2] sm:$0xff]  ;;  %vm114_vm1 = vcmask 64512  }
  0x17   :  { %v648_v2 = vld [vmem:[#allocation8 + $0x70] sm:$0xf]  ;;  %v110_v3 = vunpack.c.l.b16 %v102_v0  ;;  %v111_v4 = vunpack.c.h.b16 %v102_v0  ;;  %v797_v5 = vld [vmem:[#allocation8 + $0x74] sm:$0xf0]  ;;  %v796_v10 = vld [vmem:[#allocation8 + $0x74] sm:$0xf]  ;;  %v101_v26 = vpack.c.bf16 %v100_v1, %v100_v1 }
  0x18   :  { %v712_v6 = vld [vmem:[#allocation8 + $0xf0] sm:$0xf]  ;;  %v813_v7 = vld [vmem:[#allocation8 + $0xf4] sm:$0xf0]  ;;  %v649_v8 = vor.u32 %v797_v5, %v648_v2  ;;  %v650_v11 = vld [vmem:[#allocation8 + $0x78] sm:$0xf0] }
  0x19   :  { %v713_v9 = vor.u32 %v813_v7, %v712_v6  ;;  %v812_v12 = vld [vmem:[#allocation8 + $0xf4] sm:$0xf]  ;;  %v112_v13 = vpack.c.b16 %v110_v3, %v110_v3  ;;  %v113_v14 = vpack.c.b16 %v111_v4, %v111_v4  ;;  %v653_v15 = vor.u32 %v796_v10, %v650_v11  ;;  %v714_v16 = vld [vmem:[#allocation8 + $0xf8] sm:$0xf0]  ;;  %v640_v17 = vld [vmem:[#allocation8 + $0x60] sm:$0xf] }
  0x1a   :  { %v795_v18 = vld [vmem:[#allocation8 + $0x64] sm:$0xf0]  ;;  %353 = vmatpush.bf16.msra.mxu2 %v649_v8  ;;  %v717_v19 = vor.u32 %v812_v12, %v714_v16  ;;  %v704_v21 = vld [vmem:[#allocation8 + $0xe0] sm:$0xf]  ;;  %v794_v23 = vld [vmem:[#allocation8 + $0x64] sm:$0xf] }
  0x1b   :  { %366 = vmatpush.bf16.msra.mxu3 %v713_v9  ;;  %v641_v20 = vor.u32 %v795_v18, %v640_v17  ;;  %v811_v22 = vld [vmem:[#allocation8 + $0xe4] sm:$0xf0]  ;;  %v120_v24 = vsel %vm118_vm0, %v112_v13, 0  ;;  %v123_v25 = vsel %vm118_vm0, %v113_v14, 0  ;;  %v642_v28 = vld [vmem:[#allocation8 + $0x68] sm:$0xf0] }
  0x1c   :  { %v705_v27 = vor.u32 %v811_v22, %v704_v21  ;;  %v810_v29 = vld [vmem:[#allocation8 + $0xe4] sm:$0xf]  ;;  %132 = vmatpush.bf16.msra.mxu0 %v120_v24  ;;  %145 = vmatpush.bf16.msra.mxu1 %v123_v25  ;;  %v706_v30 = vld [vmem:[#allocation8 + $0xe8] sm:$0xf0]  ;;  %v632_v31 = vld [vmem:[#allocation8 + $0x50] sm:$0xf]  ;;  %v645_v33 = vor.u32 %v794_v23, %v642_v28 }
  0x1d   :  { %v793_v32 = vld [vmem:[#allocation8 + $0x54] sm:$0xf0]  ;;  %v709_v34 = vor.u32 %v810_v29, %v706_v30  ;;  %v696_v35 = vld [vmem:[#allocation8 + $0xd0] sm:$0xf]  ;;  %v792_v37 = vld [vmem:[#allocation8 + $0x54] sm:$0xf] }
  0x1e   :  { %v809_v36 = vld [vmem:[#allocation8 + $0xd4] sm:$0xf0]  ;;  %354 = vmatpush.bf16.msra.mxu2 %v641_v20  ;;  %v633_v38 = vor.u32 %v793_v32, %v632_v31  ;;  %v634_v40 = vld [vmem:[#allocation8 + $0x58] sm:$0xf0]  ;;  %v808_v41 = vld [vmem:[#allocation8 + $0xd4] sm:$0xf] }
  0x1f   :  { %367 = vmatpush.bf16.msra.mxu3 %v705_v27  ;;  %v697_v39 = vor.u32 %v809_v36, %v696_v35  ;;  %v698_v42 = vld [vmem:[#allocation8 + $0xd8] sm:$0xf0]  ;;  %588 = vmatmul.msk.bf16.vlgmr.msra.gmra.mxu0 %vm114_vm1, %v101_v26  ;;  %v624_v43 = vld [vmem:[#allocation8 + $0x40] sm:$0xf]  ;;  %v791_v44 = vld [vmem:[#allocation8 + $0x44] sm:$0xf0]  ;;  %v637_v47 = vor.u32 %v792_v37, %v634_v40 }
  0x20   :  { %379 = vmatpush.bf16.msrb.mxu0 %v653_v15  ;;  %392 = vmatpush.bf16.msrb.mxu1 %v717_v19  ;;  %v688_v45 = vld [vmem:[#allocation8 + $0xc0] sm:$0xf]  ;;  %v807_v46 = vld [vmem:[#allocation8 + $0xc4] sm:$0xf0]  ;;  %v701_v48 = vor.u32 %v808_v41, %v698_v42  ;;  %v790_v49 = vld [vmem:[#allocation8 + $0x44] sm:$0xf]  ;;  %v625_v51 = vor.u32 %v791_v44, %v624_v43 }
  0x21   :  { %589 = vmatmul.msk.bf16.vlgmr.msra.gmra.mxu1 %vm114_vm1, %v101_v26  ;;  %v626_v50 = vld [vmem:[#allocation8 + $0x48] sm:$0xf0]  ;;  %v689_v52 = vor.u32 %v807_v46, %v688_v45  ;;  %v806_v53 = vld [vmem:[#allocation8 + $0xc4] sm:$0xf]  ;;  %v616_v55 = vld [vmem:[#allocation8 + $0x30] sm:$0xf] }
  0x22   :  { %355 = vmatpush.bf16.msra.mxu2 %v633_v38  ;;  %v690_v54 = vld [vmem:[#allocation8 + $0xc8] sm:$0xf0]  ;;  %v789_v56 = vld [vmem:[#allocation8 + $0x34] sm:$0xf0]  ;;  %v680_v57 = vld [vmem:[#allocation8 + $0xb0] sm:$0xf]  ;;  %v629_v59 = vor.u32 %v790_v49, %v626_v50 }
  0x23   :  { %368 = vmatpush.bf16.msra.mxu3 %v697_v39  ;;  %v805_v58 = vld [vmem:[#allocation8 + $0xb4] sm:$0xf0]  ;;  %v693_v60 = vor.u32 %v806_v53, %v690_v54  ;;  %v788_v61 = vld [vmem:[#allocation8 + $0x34] sm:$0xf]  ;;  %v618_v62 = vld [vmem:[#allocation8 + $0x38] sm:$0xf0]  ;;  %v617_v0 = vor.u32 %v789_v56, %v616_v55 }
  0x24   :  { %380 = vmatpush.bf16.msrb.mxu0 %v645_v33  ;;  %393 = vmatpush.bf16.msrb.mxu1 %v709_v34  ;;  %v804_v63 = vld [vmem:[#allocation8 + $0xb4] sm:$0xf]  ;;  %v681_v1 = vor.u32 %v805_v58, %v680_v57  ;;  %v682_v2 = vld [vmem:[#allocation8 + $0xb8] sm:$0xf0]  ;;  %v608_v3 = vld [vmem:[#allocation8 + $0x20] sm:$0xf]  ;;  %v621_v7 = vor.u32 %v788_v61, %v618_v62 }
  0x25   :  { %v787_v4 = vld [vmem:[#allocation8 + $0x24] sm:$0xf0]  ;;  %v672_v5 = vld [vmem:[#allocation8 + $0xa0] sm:$0xf]  ;;  %v685_v8 = vor.u32 %v804_v63, %v682_v2  ;;  %v786_v9 = vld [vmem:[#allocation8 + $0x24] sm:$0xf] }
  0x26   :  { %356 = vmatpush.bf16.msra.mxu2 %v625_v51  ;;  %v803_v6 = vld [vmem:[#allocation8 + $0xa4] sm:$0xf0]  ;;  %v609_v10 = vor.u32 %v787_v4, %v608_v3  ;;  %v610_v12 = vld [vmem:[#allocation8 + $0x28] sm:$0xf0]  ;;  %v802_v13 = vld [vmem:[#allocation8 + $0xa4] sm:$0xf] }
  0x27   :  { %369 = vmatpush.bf16.msra.mxu3 %v689_v52  ;;  %v673_v11 = vor.u32 %v803_v6, %v672_v5  ;;  %v674_v14 = vld [vmem:[#allocation8 + $0xa8] sm:$0xf0]  ;;  %v613_v15 = vor.u32 %v786_v9, %v610_v12  ;;  %v600_v17 = vld [vmem:[#allocation8 + $0x10] sm:$0xf]  ;;  %v785_v18 = vld [vmem:[#allocation8 + $0x14] sm:$0xf0] }
  0x28   :  { %381 = vmatpush.bf16.msrb.mxu0 %v637_v47  ;;  %394 = vmatpush.bf16.msrb.mxu1 %v701_v48  ;;  %v677_v16 = vor.u32 %v802_v13, %v674_v14  ;;  %v664_v19 = vld [vmem:[#allocation8 + $0x90] sm:$0xf]  ;;  %v601_v20 = vor.u32 %v785_v18, %v600_v17  ;;  %v801_v21 = vld [vmem:[#allocation8 + $0x94] sm:$0xf0]  ;;  %v784_v22 = vld [vmem:[#allocation8 + $0x14] sm:$0xf] }
  0x29   :  { %v602_v23 = vld [vmem:[#allocation8 + $0x18] sm:$0xf0]  ;;  %v665_v24 = vor.u32 %v801_v21, %v664_v19  ;;  %v800_v26 = vld [vmem:[#allocation8 + $0x94] sm:$0xf]  ;;  %v592_v29 = vld [vmem:[#allocation8] sm:$0xf] }
  0x2a   :  { %357 = vmatpush.bf16.msra.mxu2 %v617_v0  ;;  %v605_v25 = vor.u32 %v784_v22, %v602_v23  ;;  %v666_v27 = vld [vmem:[#allocation8 + $0x98] sm:$0xf0]  ;;  %v783_v30 = vld [vmem:[#allocation8 + $0x4] sm:$0xf0]  ;;  %v656_v31 = vld [vmem:[#allocation8 + $0x80] sm:$0xf] }
  0x2b   :  { %370 = vmatpush.bf16.msra.mxu3 %v681_v1  ;;  %v669_v28 = vor.u32 %v800_v26, %v666_v27  ;;  %v593_v32 = vor.u32 %v783_v30, %v592_v29  ;;  %v799_v33 = vld [vmem:[#allocation8 + $0x84] sm:$0xf0]  ;;  %v782_v34 = vld [vmem:[#allocation8 + $0x4] sm:$0xf]  ;;  %v594_v35 = vld [vmem:[#allocation8 + $0x8] sm:$0xf0] }
  0x2c   :  { %382 = vmatpush.bf16.msrb.mxu0 %v629_v59  ;;  %395 = vmatpush.bf16.msrb.mxu1 %v693_v60  ;;  %v657_v36 = vor.u32 %v799_v33, %v656_v31  ;;  %v597_v37 = vor.u32 %v782_v34, %v594_v35  ;;  %v798_v38 = vld [vmem:[#allocation8 + $0x84] sm:$0xf]  ;;  %v658_v39 = vld [vmem:[#allocation8 + $0x88] sm:$0xf0]  ;;  %v829_v41 = vld [vmem:[#allocation10 + $0x78] sm:$0xff]  ;;  %s1002_s28 = smov [#allocation11]  }
  0x2d   :  { %v661_v40 = vor.u32 %v798_v38, %v658_v39  ;;  %v821_v42 = vld [vmem:[#allocation10 + $0x38] sm:$0xff]  ;;  %v828_v43 = vld [vmem:[#allocation10 + $0x70] sm:$0xff]  ;;  %v827_v45 = vld [vmem:[#allocation10 + $0x68] sm:$0xff]  ;;  %s574_s29 = sshll.u32 %s1002_s28, 4  ;;  %s576_s9 = sshll.u32 %s1078_s7, 4  ;;  %s575_s29 = int_to_ptr.vmem [resolvable:$true] %s574_s29  ;;  %s577_s9 = int_to_ptr.hbm [resolvable:$true] %s576_s9 }
  0x2e   :  { %358 = vmatpush.bf16.msra.mxu2 %v609_v10  ;;  %v820_v44 = vld [vmem:[#allocation10 + $0x30] sm:$0xff]  ;;  %v819_v46 = vld [vmem:[#allocation10 + $0x28] sm:$0xff]  ;;  %v826_v47 = vld [vmem:[#allocation10 + $0x60] sm:$0xff] }
  0x2f   :  { %371 = vmatpush.bf16.msra.mxu3 %v673_v11  ;;  %v818_v48 = vld [vmem:[#allocation10 + $0x20] sm:$0xff]  ;;  %v825_v49 = vld [vmem:[#allocation10 + $0x58] sm:$0xff]  ;;  %v824_v51 = vld [vmem:[#allocation10 + $0x50] sm:$0xff] }
  0x30   :  { %383 = vmatpush.bf16.msrb.mxu0 %v621_v7  ;;  %396 = vmatpush.bf16.msrb.mxu1 %v685_v8  ;;  %v103_v50 = vld [vmem:[#allocation7] sm:$0x3]  ;;  %v823_v1 = vld [vmem:[#allocation10 + $0x48] sm:$0xff]  ;;  %v816_v2 = vld [vmem:[#allocation10 + $0x10] sm:$0xff] }
  0x31   :  { %v105_v52 = vperm.slane %v103_v50, 0  ;;  %v106_v53 = vperm.slane %v103_v50, 1  ;;  %v817_v0 = vld [vmem:[#allocation10 + $0x18] sm:$0xff]  ;;  %v822_v3 = vld [vmem:[#allocation10 + $0x40] sm:$0xff]  ;;  %v815_v4 = vld [vmem:[#allocation10 + $0x8] sm:$0xff] }
  0x32   :  { %359 = vmatpush.bf16.msra.mxu2 %v601_v20  ;;  %v814_v5 = vld [vmem:[#allocation10] sm:$0xff]  ;;  %v187_v6 = vld [vmem:[%s1075_s4] sm:$0x3] }
  0x33   :  { %372 = vmatpush.bf16.msra.mxu3 %v665_v24  ;;  %v190_v7 = vperm.slane %v187_v6, 1  ;;  %v189_v11 = vperm.slane %v187_v6, 0  ;;  %v840_v26 = vld [vmem:[%s1077_s6] ss:$0 sm:$0xff] }
  0x34   :  { %384 = vmatpush.bf16.msrb.mxu0 %v613_v15  ;;  %397 = vmatpush.bf16.msrb.mxu1 %v677_v16 }
  0x36   :  { %360 = vmatpush.bf16.msra.mxu2 %v593_v32 }
  0x37   :  { %373 = vmatpush.bf16.msra.mxu3 %v657_v36 }
  0x38   :  { %385 = vmatpush.bf16.msrb.mxu0 %v605_v25  ;;  %398 = vmatpush.bf16.msrb.mxu1 %v669_v28 }
  0x3a   :  { %541 = vmatpush.bf16.msrb.mxu2 %v821_v42 }
  0x3b   :  { %554 = vmatpush.bf16.msrb.mxu3 %v829_v41 }
  0x3c   :  { %386 = vmatpush.bf16.msrb.mxu0 %v597_v37  ;;  %399 = vmatpush.bf16.msrb.mxu1 %v661_v40 }
  0x3e   :  { %542 = vmatpush.bf16.msrb.mxu2 %v820_v44 }
  0x3f   :  { %555 = vmatpush.bf16.msrb.mxu3 %v828_v43 }
  0x42   :  { %543 = vmatpush.bf16.msrb.mxu2 %v819_v46 }
  0x43   :  { %556 = vmatpush.bf16.msrb.mxu3 %v827_v45 }
  0x46   :  { %544 = vmatpush.bf16.msrb.mxu2 %v818_v48 }
  0x47   :  { %557 = vmatpush.bf16.msrb.mxu3 %v826_v47 }
  0x4a   :  { %545 = vmatpush.bf16.msrb.mxu2 %v817_v0 }
  0x4b   :  { %558 = vmatpush.bf16.msrb.mxu3 %v825_v49 }
  0x4e   :  { %546 = vmatpush.bf16.msrb.mxu2 %v816_v2 }
  0x4f   :  { %559 = vmatpush.bf16.msrb.mxu3 %v824_v51 }
  0x52   :  { %547 = vmatpush.bf16.msrb.mxu2 %v815_v4 }
  0x53   :  { %560 = vmatpush.bf16.msrb.mxu3 %v823_v1 }
  0x56   :  { %548 = vmatpush.bf16.msrb.mxu2 %v814_v5 }
  0x57   :  { %561 = vmatpush.bf16.msrb.mxu3 %v822_v3 }
  0x9c   :  { %v134_v54 = vpop.f32.mrf.mxu0 }
  0x9d   :  { %v135_v56 = vadd.f32 %v134_v54, %v105_v52 }
  0x9e   :  { %v147_v55 = vpop.f32.mrf.mxu1 }
  0x9f   :  { %v148_v57 = vadd.f32 %v147_v55, %v106_v53  ;;  %v151_v58 = vmax.f32 %v135_v56, 0.0 }
  0xa1   :  { %v152_v59 = vmax.f32 %v148_v57, 0.0  ;;  %v153_v60 = vpack.c.bf16 %v151_v58, %v151_v58 }
  0xa3   :  { %v154_v61 = vpack.c.bf16 %v152_v59, %v152_v59  ;;  %361 = vmatmul.bf16.vlgmr.msra.gmra.mxu2 %v153_v60  ;;  %387 = vmatmul.bf16.vlgmr.msrb.gmra.mxu0 %v153_v60 }
  0xa4   :  { %v136_v62 = vpop.f32.mrf.mxu0 }
  0xa5   :  { %374 = vmatmul.bf16.vlgmr.msra.gmra.mxu3 %v154_v61  ;;  %400 = vmatmul.bf16.vlgmr.msrb.gmra.mxu1 %v154_v61 }
  0xa6   :  { %v149_v63 = vpop.f32.mrf.mxu1 }
 0x120   :  { %v388_v8 = vpop.f32.mrf.mxu0 }
 0x121   :  { %v389_v10 = vadd.f32 %v388_v8, %v190_v7 }
 0x122   :  { %v401_v9 = vpop.f32.mrf.mxu1 }
 0x123   :  { %v402_v12 = vadd.f32 %v401_v9, %v389_v10 }
 0x125   :  { %v406_v13 = vmax.f32 %v402_v12, 0.0 }
 0x126   :  { %v362_v14 = vpop.f32.mrf.mxu2 }
 0x127   :  { %v363_v16 = vadd.f32 %v362_v14, %v189_v11  ;;  %v408_v17 = vpack.c.bf16 %v406_v13, %v406_v13 }
 0x128   :  { %v375_v15 = vpop.f32.mrf.mxu3  ;;  %v390_v19 = vpop.f32.mrf.mxu0 }
 0x129   :  { %v376_v18 = vadd.f32 %v375_v15, %v363_v16  ;;  %562 = vmatmul.bf16.vlgmr.msrb.gmra.mxu3 %v408_v17 }
 0x12a   :  { %v403_v20 = vpop.f32.mrf.mxu1 }
 0x12b   :  { %v405_v21 = vmax.f32 %v376_v18, 0.0 }
 0x12d   :  { %v407_v22 = vpack.c.bf16 %v405_v21, %v405_v21 }
 0x12e   :  { %v364_v23 = vpop.f32.mrf.mxu2 }
 0x12f   :  { %549 = vmatmul.bf16.vlgmr.msrb.gmra.mxu2 %v407_v22 }
 0x130   :  { %v377_v24 = vpop.f32.mrf.mxu3 }
 0x1ac   :  { %v563_v25 = vpop.f32.mrf.mxu3 }
 0x1b2   :  { %v550_v27 = vpop.f32.mrf.mxu2 }
 0x1b3   :  { %v551_v28 = vadd.f32 %v840_v26, %v550_v27 }
 0x1b4   :  { %v565_v30 = vpop.f32.mrf.mxu3 }
 0x1b5   :  { %v564_v29 = vadd.f32 %v563_v25, %v551_v28 }
 0x1b7   :  { %v567_v31 = vpack.c.bf16 %v564_v29, %v564_v29 }
 0x1b9   :  { %568 = vst [vmem:[#allocation11] sm:$0xf] %v567_v31 }
 0x1ba   :  { %v552_v32 = vpop.f32.mrf.mxu2  ;;  %579 = dma.vmem_to_hbm [thread:$0]  %s575_s29, 64, %s577_s9, [#allocation4]  }
 0x1bb   :  { %991 = dma.done.wait [#allocation4], 64  }
 0x1bc   :  { %992 = vsyncadd [#allocation4], 4294967232 }
 0x1bd   :  { %584 = vsyncpa [#allocation3], 1 }
 0x1be   :  { %585 = vsyncpa [#allocation6], 1 }
 0x1bf   :  { %586 = vsyncpa [#allocation9], 1 }
 0x1c0   :  { %587 = vsyncpa [#allocation4], 1 }

</bundles_post_ra>
